<compile_context>
chip_gen: v7x
topology: tpu7x:2x2x1
jax: 0.10.0
libtpu: 0.0.40
codegen_flags: <defaults>
</compile_context>

<pallas_src>
import math

import jax
import jax.numpy as jnp
from jax.experimental import pallas as pl
from jax.experimental.pallas import tpu as pltpu

_LANE = 128


def _vertex_to_volume_kernel(x_ref, o_ref):
    # x_ref: (TR, N+1) tile, o_ref: (TR, N) tile.  Adjacent-vertex average along lanes.
    # Compute stays in the input dtype to match the PyTorch forward semantics
    # (0.5 * (a + b) in-dtype); the op is HBM-bound so the VPU work is hidden.
    x = x_ref[...]
    o_ref[...] = (0.5 * (x[:, :-1] + x[:, 1:])).astype(o_ref.dtype)


def vertex_to_volume_interpolator_1d(
    x,
    *,
    pallas_min_bytes=1 << 20,
    pallas_min_volumes=64,
    _max_tile_rows=None,
):
    """y[..., j] = 0.5 * (x[..., j] + x[..., j+1]).  Pallas TPU kernel wrapper."""
    *batch, np1 = x.shape
    n = np1 - 1
    rows = math.prod(batch) if batch else 1
    total_bytes = x.size * x.dtype.itemsize

    def _xla_fallback(x):
        return 0.5 * (x[..., :-1] + x[..., 1:])

    # Fallback: degenerate / tiny inputs (launch overhead dominates), integer dtypes
    # (0.5 * (...) promotes to float, matching torch), and very narrow outputs
    # (n << 128 lanes -> masked partial stores; let XLA fuse it instead).
    if (
        n <= 0
        or rows == 0
        or total_bytes < pallas_min_bytes
        or n < pallas_min_volumes
        or not jnp.issubdtype(x.dtype, jnp.floating)
    ):
        return _xla_fallback(x)

    itemsize = x.dtype.itemsize
    sublane = {1: 32, 2: 16}.get(itemsize, 8)      # sublane packing per dtype

    # Lane-padded widths: what the tiles actually occupy in VMEM (np1 = n+1 is
    # typically 1 mod 128, so the input tile pads up a whole extra lane-tile).
    np1_pad = pl.cdiv(np1, _LANE) * _LANE
    n_pad = pl.cdiv(n, _LANE) * _LANE
    bytes_per_row_pad = (np1_pad + n_pad) * itemsize

    # Generation-aware VMEM capacity (v5e/v6e: 128 MiB, v7x: 64 MiB per core).
    try:
        vmem_cap = int(getattr(pltpu.get_tpu_info(), "vmem_capacity_bytes", 64 << 20))
    except Exception:
        vmem_cap = 64 << 20                        # conservative (v7x)

    # Per-pipeline-stage (in + out) byte budget.  Double buffering => ~2x this
    # resident, i.e. <= VMEM/2, leaving plenty of headroom everywhere.
    stage_budget = min(vmem_cap // 4, 24 << 20)

    tile_rows = (stage_budget // bytes_per_row_pad) // sublane * sublane
    if _max_tile_rows is not None:                 # test hook: force multi-block grids
        tile_rows = min(tile_rows, max(sublane, (_max_tile_rows // sublane) * sublane))
    if tile_rows < sublane:
        # TODO(synk): very wide N (a single sublane-row tile exceeds the VMEM budget)
        # should use lane-axis halo tiling (overlapping blocks / pl.Element offsets)
        # instead of falling back to XLA.
        return _xla_fallback(x)

    if rows > tile_rows:
        tr = tile_rows
    elif rows >= 2 * sublane and total_bytes >= (4 << 20):
        # Wide-but-few-rows input: force >= 2 grid blocks so both v7x TensorCores
        # get work under dimension_semantics=("parallel",).  No effect on v5e/v6e.
        tr = min(rows, pl.cdiv(pl.cdiv(rows, 2), sublane) * sublane)
    else:
        tr = rows                                  # single full-dim block (always legal)

    grid_rows = pl.cdiv(rows, tr)                  # partial edge block handled by Pallas

    # VMEM limit from the *padded* double-buffered tile footprint plus headroom,
    # capped at 3/4 of physical VMEM (<= 48 MiB on v7x, <= 96 MiB on v5e/v6e).
    tr_pad = pl.cdiv(tr, sublane) * sublane
    tile_bytes_pad = tr_pad * (np1_pad + n_pad) * itemsize
    vmem_limit = int(min(max(2 * tile_bytes_pad + (4 << 20), 16 << 20),
                         (vmem_cap * 3) // 4))

    x2 = x.reshape(rows, np1)
    y2 = pl.pallas_call(
        _vertex_to_volume_kernel,
        out_shape=jax.ShapeDtypeStruct((rows, n), x.dtype),
        grid_spec=pltpu.PrefetchScalarGridSpec(
            num_scalar_prefetch=0,
            grid=(grid_rows,),
            in_specs=[pl.BlockSpec((tr, np1), lambda i: (i, 0))],
            out_specs=pl.BlockSpec((tr, n), lambda i: (i, 0)),
        ),
        compiler_params=pltpu.CompilerParams(
            dimension_semantics=("parallel",),
            vmem_limit_bytes=vmem_limit,
        ),
    )(x2)

    return y2.reshape(*batch, n)


if __name__ == "__main__":
    key = jax.random.PRNGKey(0)

    # Small demo shape consistent with the module: (batch, channels, n+1 vertices),
    # with n = 128 volumes so the output tile is lane-dense.
    B, C, NP1 = 2, 4, 129
    x = jax.random.normal(key, (B, C, NP1), dtype=jnp.float32)

    # Force the Pallas path (the default byte threshold would route ~4 KB to XLA).
    y = jax.block_until_ready(vertex_to_volume_interpolator_1d(x, pallas_min_bytes=0))
    y_ref = 0.5 * (x[..., :-1] + x[..., 1:])
    assert y.shape == (B, C, NP1 - 1)
    assert jnp.allclose(y, y_ref, atol=1e-6, rtol=1e-6), "mismatch vs reference"

    # Multi-block grid with a NON-divisible row count (rows=20, tile=8 -> 3 blocks,
    # last one partial): exercises the masked edge block that replaced pad + slice.
    x2 = jax.random.normal(jax.random.PRNGKey(0), (4, 5, NP1), dtype=jnp.float32)
    y2 = jax.block_until_ready(
        vertex_to_volume_interpolator_1d(x2, pallas_min_bytes=0, _max_tile_rows=8)
    )
    y2_ref = 0.5 * (x2[..., :-1] + x2[..., 1:])
    assert y2.shape == (4, 5, NP1 - 1)
    assert jnp.allclose(y2, y2_ref, atol=1e-6, rtol=1e-6), "mismatch vs reference (tiled)"

    # bf16 path (in-dtype compute, matching the torch module's semantics).
    x3 = jax.random.normal(jax.random.PRNGKey(0), (8, NP1), dtype=jnp.bfloat16)
    y3 = jax.block_until_ready(vertex_to_volume_interpolator_1d(x3, pallas_min_bytes=0))
    y3_ref = 0.5 * (x3[..., :-1] + x3[..., 1:])
    assert jnp.allclose(y3.astype(jnp.float32), y3_ref.astype(jnp.float32),
                        atol=1e-2, rtol=1e-2), "mismatch vs reference (bf16)"

    print("KERNEL_OK")
</pallas_src>

<mosaic_0001>
module attributes {stable_mosaic.version = 11 : i64} {
  func.func @_vertex_to_volume_kernel(%arg0: i32, %arg1: memref<8x129xf32, #tpu.memory_space<vmem>>, %arg2: memref<8x128xf32, #tpu.memory_space<vmem>>) attributes {dimension_semantics = [#tpu.dimension_semantics<parallel>], iteration_bounds = array<i64: 1>, scalar_prefetch = 0 : i64, scratch_operands = 0 : i64, tpu.core_type = #tpu.core_type<tc>, window_params = [{transform_indices = @transform_0, window_bounds = array<i64: 8, 129>}, {transform_indices = @transform_1, window_bounds = array<i64: 8, 128>}]} {
    %c0 = arith.constant 0 : index
    %c0_0 = arith.constant 0 : index
    %0 = vector.load %arg1[%c0, %c0_0] : memref<8x129xf32, #tpu.memory_space<vmem>>, vector<8x129xf32>
    %1 = vector.extract_strided_slice %0 {offsets = [0, 0], sizes = [8, 128], strides = [1, 1]} : vector<8x129xf32> to vector<8x128xf32>
    %2 = vector.extract_strided_slice %0 {offsets = [0, 1], sizes = [8, 128], strides = [1, 1]} : vector<8x129xf32> to vector<8x128xf32>
    %3 = arith.addf %1, %2 : vector<8x128xf32>
    %cst = arith.constant 5.000000e-01 : f32
    %4 = vector.broadcast %cst : f32 to vector<8x128xf32>
    %5 = arith.mulf %4, %3 : vector<8x128xf32>
    %c0_1 = arith.constant 0 : index
    %c0_2 = arith.constant 0 : index
    %6 = vector.load %arg2[%c0_1, %c0_2] : memref<8x128xf32, #tpu.memory_space<vmem>>, vector<8x128xf32>
    tpu.vector_store %arg2[%c0_1, %c0_2], %5 {strides = array<i32>} : memref<8x128xf32, #tpu.memory_space<vmem>>, vector<8x128xf32>,
    return
  }
  func.func @transform_0(%arg0: i32) -> (i32, i32) {
    %c0_i32 = arith.constant 0 : i32
    %c0_i32_0 = arith.constant 0 : i32
    return %arg0, %c0_i32 : i32, i32
  }
  func.func @transform_1(%arg0: i32) -> (i32, i32) {
    %c0_i32 = arith.constant 0 : i32
    %c0_i32_0 = arith.constant 0 : i32
    return %arg0, %c0_i32 : i32, i32
  }
}

</mosaic_0001>

<bundles_post_ra>
// kernel: tpu_custom_call.1
= control target key start
LH: loop header
LB: loop body
LE: loop exit
PB: predicated region body
PF: predicated region fallthrough
CT: control target
= control target key end

     0   :  { %6 = vsyncpa [#allocation3], 0  ;;  %s138_s0 = inlined_call_operand.hbm [shape: f32[8,129], index: 0, kind: input, shape index: {}]   ;;  %s139_s1 = inlined_call_operand.hbm [shape: f32[8,128], index: 1, kind: output, shape index: {}]  }
   0x1   :  { %7 = vsyncpa [#allocation4], 0  ;;  %s101_s6 = smov [#allocation2]   ;;  %s53_s10 = scalar_lea.hbm %s138_s0, 256 }
   0x2   :  { %s14_s7 = sshll.u32 %s101_s6, 4  ;;  %p54_p0 = scmp.ne.s32.totalorder %s138_s0, %s53_s10  ;;  %s15_s7 = int_to_ptr.vmem [resolvable:$true] %s14_s7 }
   0x3   :  { %p57_p1 = scmp.lt.u32.totalorder %s53_s10, %s138_s0 }
   0x5   :  { %p59_p2 = pnand %p57_p1, %p54_p0 }
   0x7   :  { %62 = shalt.err (!%p59_p2)
}
   0x8   :  { %s63_s15 = scalar_lea.vmem %s15_s7, 256  ;;  %p68_p4 = scmp.lt.s32.totalorder %s15_s7, %s15_s7 }
   0x9   :  { %p64_p3 = scmp.ne.s32.totalorder %s15_s7, %s63_s15  ;;  %p69_p5 = scmp.lt.s32.totalorder %s63_s15, %s63_s15 }
   0xb   :  { %p70_p6 = por %p69_p5, %p68_p4 }
   0xd   :  { %p71_p7 = pnand %p70_p6, %p64_p3 }
   0xf   :  { %74 = shalt.err (!%p71_p7)
}
  0x10   :  { %17 = dma.hbm_to_vmem [thread:$0]  %s138_s0, 256, %s15_s7, [#allocation3]  }
  0x11   :  { %97 = dma.done.wait [#allocation3], 256  }
  0x12   :  { %98 = vsyncadd [#allocation3], 4294967040  ;;  %v21_v0 = vld [vmem:[#allocation2] sm:$0xff]  ;;  %s102_s18 = smov 127   ;;  %v22_v1 = vld [vmem:[#allocation2 + $0x8] sm:$0xff]  ;;  %vm29_vm0 = vcmask 1039360  }
  0x13   :  { %25 = vrot.lane.b32.xlu0 %v21_v0, %s102_s18  ;;  %s103_s19 = smov [#allocation5]  }
  0x14   :  { %s41_s20 = sshll.u32 %s103_s19, 4  ;;  %s42_s20 = int_to_ptr.vmem [resolvable:$true] %s41_s20 }
  0x15   :  { %s75_s21 = scalar_lea.vmem %s42_s20, 128  ;;  %p80_p9 = scmp.lt.s32.totalorder %s42_s20, %s42_s20 }
  0x16   :  { %p76_p8 = scmp.ne.s32.totalorder %s42_s20, %s75_s21  ;;  %p81_p10 = scmp.lt.s32.totalorder %s75_s21, %s75_s21 }
  0x17   :  { %27 = vrot.lane.b32.xlu0 %v22_v1, %s102_s18 }
  0x18   :  { %p82_p11 = por %p81_p10, %p80_p9 }
  0x1a   :  { %p83_p12 = pnand %p82_p11, %p76_p8 }
  0x85   :  { %v26_v2 = vpop.permute.xlu0 %25 }
  0x89   :  { %v28_v3 = vpop.permute.xlu0 %27 }
  0x8a   :  { %v30_v4 = vsel %vm29_vm0, %v26_v2, %v28_v3 }
  0x8b   :  { %v32_v5 = vadd.f32 %v30_v4, %v21_v0 }
  0x8d   :  { %v33_v6 = vmul.f32 0.5, %v32_v5 }
  0x8f   :  { %34 = vst [vmem:[#allocation5] sm:$0xff] %v33_v6 }
  0x90   :  { %86 = shalt.err (!%p83_p12)
}
  0x91   :  { %s87_s23 = scalar_lea.hbm %s139_s1, 128 }
  0x92   :  { %p88_p13 = scmp.ne.s32.totalorder %s139_s1, %s87_s23  ;;  %p91_p0 = scmp.lt.u32.totalorder %s87_s23, %s139_s1 }
  0x94   :  { %p93_p1 = pnand %p91_p0, %p88_p13 }
  0x96   :  { %96 = shalt.err (!%p93_p1)
}
  0x97   :  { %44 = dma.vmem_to_hbm [thread:$0]  %s42_s20, 128, %s139_s1, [#allocation4]  }
  0x98   :  { %99 = dma.done.wait [#allocation4], 128  }
  0x99   :  { %100 = vsyncadd [#allocation4], 4294967168 }
  0x9a   :  { %48 = vsyncpa [#allocation3], 1 }
  0x9b   :  { %49 = vsyncpa [#allocation4], 1 }

</bundles_post_ra>
